<compile_context>
chip_gen: v5e
topology: v5e:2x2
jax: 0.10.0
libtpu: 0.0.40
codegen_flags: <defaults>
</compile_context>

<pallas_src>
import jax
import jax.numpy as jnp
from jax.experimental import pallas as pl
from jax.experimental.pallas import tpu as pltpu


def _round_up(x, m):
    return ((x + m - 1) // m) * m


def _cdiv(a, b):
    return -(-a // b)


def mlp_kernel(x_ref, w1_ref, b1_ref, w2_ref, b2_ref, o_ref):
    # Cast x on the VPU in-kernel (avoids a separate XLA pad/cast pass over x
    # in HBM before the kernel; for f32 weights this is a no-op).
    x = x_ref[...].astype(w1_ref.dtype)
    # hidden = relu(x @ W1 + b1)   (MXU matmul, f32 accumulation)
    h = jnp.dot(x, w1_ref[...], preferred_element_type=jnp.float32)
    h = jnp.maximum(h + b1_ref[...], 0.0)          # bias + ReLU in f32 on VPU
    # out = h @ W2 + b2   (narrow N = n_output; result stored unpadded)
    out = jnp.dot(h.astype(w2_ref.dtype), w2_ref[...],
                  preferred_element_type=jnp.float32)
    o_ref[...] = (out + b2_ref[...]).astype(o_ref.dtype)


def prepare_params(w1, b1, w2, b2, *, use_bf16=False):
    """One-time padding / casting of the Net parameters for the kernel.

    w1: (n_input, n_hidden), b1: (n_hidden,), w2: (n_hidden, n_output),
    b2: (n_output,)  -- i.e. weights stored pre-transposed vs nn.Linear so
    the kernel computes x @ W + b.
    Only n_hidden is padded (to 128 lanes); padding is numerically exact
    (zero weights + zero bias -> relu(0) = 0 -> contributes nothing).
    """
    n_input, n_hidden = w1.shape
    n_output = w2.shape[1]
    h_pad = _round_up(n_hidden, 128)
    # TODO(synk): for production-sized layers on v6e/v7x, align h_pad to 256
    # (2x256x256 MXU) instead of 128.
    mm_dtype = jnp.bfloat16 if use_bf16 else jnp.float32

    w1_p = jnp.zeros((n_input, h_pad), mm_dtype).at[:, :n_hidden].set(
        w1.astype(mm_dtype))
    b1_p = jnp.zeros((1, h_pad), jnp.float32).at[:, :n_hidden].set(
        b1.reshape(1, -1).astype(jnp.float32))
    w2_p = jnp.zeros((h_pad, n_output), mm_dtype).at[:n_hidden, :].set(
        w2.astype(mm_dtype))
    b2_p = b2.reshape(1, n_output).astype(jnp.float32)

    return {"w1": w1_p, "b1": b1_p, "w2": w2_p, "b2": b2_p,
            "n_input": n_input, "n_hidden": n_hidden, "n_output": n_output}


def mlp_forward(x, params, *, block_batch=1024):
    """Net.forward: predict(relu(hidden(x))) as one fused Pallas kernel.

    Weights stay VMEM-resident across batch tiles; the hidden activation
    never touches HBM; the output writeback is narrow (n_output lanes).
    """
    batch, n_input = x.shape
    assert n_input == params["n_input"]
    w1_p, b1_p = params["w1"], params["b1"]
    w2_p, b2_p = params["w2"], params["b2"]
    n_output = params["n_output"]
    h_pad = w1_p.shape[1]
    out_dtype = x.dtype

    # Sublane alignment: bf16 packs 16 rows per vreg, f32 packs 8.
    align = 16 if w1_p.dtype == jnp.bfloat16 else 8

    # Pick the batch tile so the last tile carries minimal padding; use at
    # least 2 tiles when the batch allows it (keeps both v7x TCs busy on the
    # "parallel" axis -- free on single-TC v5e/v6e).
    nt = _cdiv(batch, block_batch)
    if nt < 2 and batch >= 2 * align:
        nt = 2
    tb = _round_up(_cdiv(batch, nt), align)

    # Explicit VMEM budget (everything is double-buffered by the BlockSpec
    # pipeline).  48 MiB budget fits v7x's 64 MiB/TC with headroom and is
    # trivially satisfied on v5e/v6e (128 MiB).
    def vmem_need(tb_):
        wbytes = 2 * (w1_p.size + w2_p.size) * w1_p.dtype.itemsize
        bbytes = 2 * (b1_p.size + b2_p.size) * 4
        iobytes = 2 * tb_ * (n_input * x.dtype.itemsize
                             + n_output * out_dtype.itemsize)
        return wbytes + bbytes + iobytes

    VMEM_BUDGET = 48 << 20
    while vmem_need(tb) > VMEM_BUDGET and tb > align:
        tb = _round_up(tb // 2, align)
    # TODO(synk): if resident (double-buffered) weights alone exceed the
    # budget (very large n_hidden), add a K-tiling grid axis over h_pad with
    # an f32 accumulator scratch instead of shrinking the batch tile.

    nt = _cdiv(batch, tb)
    b_pad = nt * tb

    # Only x needs per-call padding (batch rows); padded rows produce garbage
    # that is sliced off below and never read otherwise.
    x_in = x if b_pad == batch else (
        jnp.zeros((b_pad, n_input), x.dtype).at[:batch].set(x))

    vmem_limit = min(max(2 * vmem_need(tb) + (2 << 20), 32 << 20), 64 << 20)

    out = pl.pallas_call(
        mlp_kernel,
        out_shape=jax.ShapeDtypeStruct((b_pad, n_output), out_dtype),
        grid_spec=pl.GridSpec(
            grid=(nt,),
            in_specs=[
                pl.BlockSpec((tb, n_input), lambda i: (i, 0)),       # x tile
                pl.BlockSpec((n_input, h_pad), lambda i: (0, 0)),    # W1 (resident)
                pl.BlockSpec((1, h_pad), lambda i: (0, 0)),          # b1 (resident)
                pl.BlockSpec((h_pad, n_output), lambda i: (0, 0)),   # W2 (resident)
                pl.BlockSpec((1, n_output), lambda i: (0, 0)),       # b2 (resident)
            ],
            out_specs=pl.BlockSpec((tb, n_output), lambda i: (i, 0)),
        ),
        compiler_params=pltpu.CompilerParams(
            dimension_semantics=("parallel",),
            vmem_limit_bytes=int(vmem_limit)),
    )(x_in, w1_p, b1_p, w2_p, b2_p)

    return out[:batch] if b_pad != batch else out


def init_params(key, n_input, n_hidden, n_output):
    """Deterministic init matching nn.Linear's U(-1/sqrt(fan_in), 1/sqrt(fan_in)).

    Weights returned as (in_features, out_features) so x @ W matches
    nn.Linear(x) = x @ W.T + b.
    """
    k1, k2, k3, k4 = jax.random.split(key, 4)
    lim1 = 1.0 / jnp.sqrt(jnp.float32(n_input))
    lim2 = 1.0 / jnp.sqrt(jnp.float32(n_hidden))
    w1 = jax.random.uniform(k1, (n_input, n_hidden), jnp.float32, -lim1, lim1)
    b1 = jax.random.uniform(k2, (n_hidden,), jnp.float32, -lim1, lim1)
    w2 = jax.random.uniform(k3, (n_hidden, n_output), jnp.float32, -lim2, lim2)
    b2 = jax.random.uniform(k4, (n_output,), jnp.float32, -lim2, lim2)
    return w1, b1, w2, b2


if __name__ == "__main__":
    n_input, n_hidden, n_output = 16, 32, 4
    batch = 8

    key = jax.random.PRNGKey(0)
    kx, kp = jax.random.split(key)
    x = jax.random.normal(kx, (batch, n_input), jnp.float32)
    w1, b1, w2, b2 = init_params(kp, n_input, n_hidden, n_output)

    # reference in plain JAX (same math as the PyTorch module, f32)
    ref = jnp.maximum(x @ w1 + b1, 0.0) @ w2 + b2

    # exact f32 path (default -- matches the f32 PyTorch module)
    params_f32 = prepare_params(w1, b1, w2, b2, use_bf16=False)
    out = mlp_forward(x, params_f32)
    jax.block_until_ready(out)
    assert out.shape == (batch, n_output)
    assert jnp.allclose(out, ref, atol=1e-5, rtol=1e-5)

    # opt-in bf16 MXU path (f32 accumulation) -> relaxed tolerance
    params_bf16 = prepare_params(w1, b1, w2, b2, use_bf16=True)
    out_bf = mlp_forward(x, params_bf16)
    jax.block_until_ready(out_bf)
    assert out_bf.shape == (batch, n_output)
    assert jnp.allclose(out_bf, ref, atol=3e-2, rtol=3e-2)

    print("KERNEL_OK")
</pallas_src>

<mosaic_0001>
module attributes {stable_mosaic.version = 11 : i64} {
  func.func @mlp_kernel(%arg0: i32, %arg1: memref<8x16xf32, #tpu.memory_space<vmem>>, %arg2: memref<16x128xf32, #tpu.memory_space<vmem>>, %arg3: memref<1x128xf32, #tpu.memory_space<vmem>>, %arg4: memref<128x4xf32, #tpu.memory_space<vmem>>, %arg5: memref<1x4xf32, #tpu.memory_space<vmem>>, %arg6: memref<8x4xf32, #tpu.memory_space<vmem>>) attributes {dimension_semantics = [#tpu.dimension_semantics<parallel>], iteration_bounds = array<i64: 1>, scalar_prefetch = 0 : i64, scratch_operands = 0 : i64, tpu.core_type = #tpu.core_type<tc>, window_params = [{transform_indices = @transform_0, window_bounds = array<i64: 8, 16>}, {pipeline_mode = #tpu.pipeline_mode<synchronous>, transform_indices = @transform_1, window_bounds = array<i64: 16, 128>}, {pipeline_mode = #tpu.pipeline_mode<synchronous>, transform_indices = @transform_2, window_bounds = array<i64: 1, 128>}, {pipeline_mode = #tpu.pipeline_mode<synchronous>, transform_indices = @transform_3, window_bounds = array<i64: 128, 4>}, {pipeline_mode = #tpu.pipeline_mode<synchronous>, transform_indices = @transform_4, window_bounds = array<i64: 1, 4>}, {transform_indices = @transform_5, window_bounds = array<i64: 8, 4>}]} {
    %c0 = arith.constant 0 : index
    %c0_0 = arith.constant 0 : index
    %0 = vector.load %arg1[%c0, %c0_0] : memref<8x16xf32, #tpu.memory_space<vmem>>, vector<8x16xf32>
    %c0_1 = arith.constant 0 : index
    %c0_2 = arith.constant 0 : index
    %1 = vector.load %arg2[%c0_1, %c0_2] : memref<16x128xf32, #tpu.memory_space<vmem>>, vector<16x128xf32>
    %cst = arith.constant dense<0.000000e+00> : vector<8x128xf32>
    %2 = tpu.matmul %0, %1, %cst {dimension_numbers = #tpu.dot_dimension_numbers<[1], [0], [0], [1], [0, 0, 1, 1], [], []>} : vector<8x16xf32>, vector<16x128xf32>, vector<8x128xf32> -> vector<8x128xf32>
    %c0_3 = arith.constant 0 : index
    %c0_4 = arith.constant 0 : index
    %3 = vector.load %arg3[%c0_3, %c0_4] : memref<1x128xf32, #tpu.memory_space<vmem>>, vector<1x128xf32>
    %4 = vector.broadcast %3 : vector<1x128xf32> to vector<8x128xf32>
    %5 = arith.addf %2, %4 : vector<8x128xf32>
    %cst_5 = arith.constant 0.000000e+00 : f32
    %6 = vector.broadcast %cst_5 : f32 to vector<8x128xf32>
    %7 = arith.maximumf %5, %6 : vector<8x128xf32>
    %c0_6 = arith.constant 0 : index
    %c0_7 = arith.constant 0 : index
    %8 = vector.load %arg4[%c0_6, %c0_7] : memref<128x4xf32, #tpu.memory_space<vmem>>, vector<128x4xf32>
    %cst_8 = arith.constant dense<0.000000e+00> : vector<8x4xf32>
    %9 = tpu.matmul %7, %8, %cst_8 {dimension_numbers = #tpu.dot_dimension_numbers<[1], [0], [0], [1], [0, 0, 1, 1], [], []>} : vector<8x128xf32>, vector<128x4xf32>, vector<8x4xf32> -> vector<8x4xf32>
    %c0_9 = arith.constant 0 : index
    %c0_10 = arith.constant 0 : index
    %10 = vector.load %arg5[%c0_9, %c0_10] : memref<1x4xf32, #tpu.memory_space<vmem>>, vector<1x4xf32>
    %11 = vector.broadcast %10 : vector<1x4xf32> to vector<8x4xf32>
    %12 = arith.addf %9, %11 : vector<8x4xf32>
    %c0_11 = arith.constant 0 : index
    %c0_12 = arith.constant 0 : index
    %13 = vector.load %arg6[%c0_11, %c0_12] : memref<8x4xf32, #tpu.memory_space<vmem>>, vector<8x4xf32>
    tpu.vector_store %arg6[%c0_11, %c0_12], %12 {strides = array<i32>} : memref<8x4xf32, #tpu.memory_space<vmem>>, vector<8x4xf32>,
    return
  }
  func.func @transform_0(%arg0: i32) -> (i32, i32) {
    %c0_i32 = arith.constant 0 : i32
    %c0_i32_0 = arith.constant 0 : i32
    return %arg0, %c0_i32 : i32, i32
  }
  func.func @transform_1(%arg0: i32) -> (i32, i32) {
    %c0_i32 = arith.constant 0 : i32
    %c0_i32_0 = arith.constant 0 : i32
    %c0_i32_1 = arith.constant 0 : i32
    return %c0_i32, %c0_i32_0 : i32, i32
  }
  func.func @transform_2(%arg0: i32) -> (i32, i32) {
    %c0_i32 = arith.constant 0 : i32
    %c0_i32_0 = arith.constant 0 : i32
    %c0_i32_1 = arith.constant 0 : i32
    return %c0_i32, %c0_i32_0 : i32, i32
  }
  func.func @transform_3(%arg0: i32) -> (i32, i32) {
    %c0_i32 = arith.constant 0 : i32
    %c0_i32_0 = arith.constant 0 : i32
    %c0_i32_1 = arith.constant 0 : i32
    return %c0_i32, %c0_i32_0 : i32, i32
  }
  func.func @transform_4(%arg0: i32) -> (i32, i32) {
    %c0_i32 = arith.constant 0 : i32
    %c0_i32_0 = arith.constant 0 : i32
    %c0_i32_1 = arith.constant 0 : i32
    return %c0_i32, %c0_i32_0 : i32, i32
  }
  func.func @transform_5(%arg0: i32) -> (i32, i32) {
    %c0_i32 = arith.constant 0 : i32
    %c0_i32_0 = arith.constant 0 : i32
    return %arg0, %c0_i32 : i32, i32
  }
}

</mosaic_0001>

<bundles_post_ra>
// kernel: tpu_custom_call.1
= control target key start
LH: loop header
LB: loop body
LE: loop exit
PB: predicated region body
PF: predicated region fallthrough
CT: control target
= control target key end

     0   :  { %vm27_vm0 = vcmask 130048   ;;  %vm92_vm1 = vcmask 31744   ;;  %s197_s1 = inlined_call_operand.vmem [shape: f32[16,128], index: 1, kind: input, shape index: {}]   ;;  %s198_s0 = inlined_call_operand.vmem [shape: f32[8,16], index: 0, kind: input, shape index: {}]   ;;  %s199_s3 = inlined_call_operand.vmem [shape: f32[128,4], index: 3, kind: input, shape index: {}]   ;;  %s200_s2 = inlined_call_operand.vmem [shape: f32[1,128], index: 2, kind: input, shape index: {}]   ;;  %s201_s4 = inlined_call_operand.vmem [shape: f32[1,4], index: 4, kind: input, shape index: {}]   ;;  %s202_s5 = inlined_call_operand.vmem [shape: f32[8,4], index: 5, kind: output, shape index: {}]  }
   0x1   :  { %v22_v0 = vld [vmem:[%s197_s1 + $0x8] sm:$0xff]  ;;  %v21_v1 = vld [vmem:[%s197_s1] sm:$0xff]  ;;  %v67_v3 = vld [vmem:[%s199_s3 + $0x78] sm:$0xff] }
   0x2   :  { %45 = vmatpush.msra.mxu0 %v22_v0  ;;  %v20_v2 = vld [vmem:[%s198_s0] sm:$0xff]  ;;  %v66_v4 = vld [vmem:[%s199_s3 + $0x70] sm:$0xff]  ;;  %72 = vmatpush.msra.mxu1 %v67_v3  ;;  %v65_v5 = vld [vmem:[%s199_s3 + $0x68] sm:$0xff] }
   0x3   :  { %v64_v6 = vld [vmem:[%s199_s3 + $0x60] sm:$0xff]  ;;  %v63_v7 = vld [vmem:[%s199_s3 + $0x58] sm:$0xff]  ;;  %v62_v8 = vld [vmem:[%s199_s3 + $0x50] sm:$0xff] }
   0x4   :  { %46 = vmatpush.msra.mxu0 %v21_v1  ;;  %73 = vmatpush.msra.mxu1 %v66_v4  ;;  %v61_v9 = vld [vmem:[%s199_s3 + $0x48] sm:$0xff]  ;;  %v60_v10 = vld [vmem:[%s199_s3 + $0x40] sm:$0xff]  ;;  %v59_v11 = vld [vmem:[%s199_s3 + $0x38] sm:$0xff] }
   0x5   :  { %98 = vmatmul.msk.f32.vlgmr.msra.gmra.mxu0 %vm27_vm0, %v20_v2  ;;  %v58_v12 = vld [vmem:[%s199_s3 + $0x30] sm:$0xff]  ;;  %v57_v13 = vld [vmem:[%s199_s3 + $0x28] sm:$0xff]  ;;  %v56_v14 = vld [vmem:[%s199_s3 + $0x20] sm:$0xff] }
   0x6   :  { %74 = vmatpush.msra.mxu1 %v65_v5  ;;  %v55_v15 = vld [vmem:[%s199_s3 + $0x18] sm:$0xff]  ;;  %v54_v16 = vld [vmem:[%s199_s3 + $0x10] sm:$0xff]  ;;  %v53_v17 = vld [vmem:[%s199_s3 + $0x8] sm:$0xff] }
   0x7   :  { %v52_v18 = vld [vmem:[%s199_s3] sm:$0xff] }
   0x8   :  { %75 = vmatpush.msra.mxu1 %v64_v6  ;;  %v99_v19 = vld [vmem:[%s200_s2] ss:$0 sm:$0xff] }
   0x9   :  { %v100_v23 = vld [vmem:[%s201_s4] ss:$0 sm:$0xff] }
   0xa   :  { %76 = vmatpush.msra.mxu1 %v63_v7 }
   0xc   :  { %77 = vmatpush.msra.mxu1 %v62_v8 }
   0xe   :  { %78 = vmatpush.msra.mxu1 %v61_v9 }
  0x10   :  { %79 = vmatpush.msra.mxu1 %v60_v10 }
  0x12   :  { %80 = vmatpush.msra.mxu1 %v59_v11 }
  0x14   :  { %81 = vmatpush.msra.mxu1 %v58_v12 }
  0x16   :  { %82 = vmatpush.msra.mxu1 %v57_v13 }
  0x18   :  { %83 = vmatpush.msra.mxu1 %v56_v14 }
  0x1a   :  { %84 = vmatpush.msra.mxu1 %v55_v15 }
  0x1c   :  { %85 = vmatpush.msra.mxu1 %v54_v16 }
  0x1e   :  { %86 = vmatpush.msra.mxu1 %v53_v17 }
  0x20   :  { %87 = vmatpush.msra.mxu1 %v52_v18 }
  0x82   :  { %v48_v20 = vpop.f32.mrf.mxu0 }
  0x83   :  { %v49_v21 = vadd.f32 %v99_v19, %v48_v20 }
  0x85   :  { %v51_v22 = vmax.f32 %v49_v21, 0.0 }
  0x87   :  { %88 = vmatmul.f32.vlgmr.msra.gmra.mxu1 %v51_v22 }
 0x104   :  { %v89_v24 = vpop.f32.mrf.mxu1 }
 0x105   :  { %v90_v25 = vadd.f32 %v100_v23, %v89_v24 }
 0x107   :  { %93 = vst.msk [vmem:[%s202_s5] sm:$0xff] %vm92_vm1, %v90_v25 }

</bundles_post_ra>
